<compile_context>
chip_gen: v5e
topology: v5e:2x2
jax: 0.10.0
libtpu: 0.0.40
codegen_flags: <defaults>
</compile_context>

<pallas_src>
import numpy as np
import jax
import jax.numpy as jnp
from jax import lax
from jax.experimental import pallas as pl
from jax.experimental.pallas import tpu as pltpu


def bilinear_matrix(n_in: int, n_out: int) -> np.ndarray:
    """1-D bilinear resize matrix, align_corners=True (numpy, f32)."""
    M = np.zeros((n_out, n_in), np.float32)
    if n_in == 1 or n_out == 1:
        M[:, 0] = 1.0
        return M
    for o in range(n_out):
        src = o * (n_in - 1) / (n_out - 1)
        i0 = min(int(np.floor(src)), n_in - 1)
        i1 = min(i0 + 1, n_in - 1)
        w = src - i0
        M[o, i0] += 1.0 - w
        M[o, i1] += w
    return M


def prepare_params(w3_hwio, g1, be1, rm1, rv1, w1, g2, be2, rm2, rv2, wu, bu,
                   H, W, eps=1e-5):
    """Fold eval-mode BN into the conv weights; build kernel-layout params."""
    kh, kw, Cin, dim = w3_hwio.shape
    Cout = w1.shape[1]
    s1 = g1 / jnp.sqrt(rv1 + eps)
    b1 = be1 - rm1 * s1
    s2 = g2 / jnp.sqrt(rv2 + eps)
    b2 = be2 - rm2 * s2
    # 3x3 conv weight -> (dim, 9*Cin) im2col layout (kh, kw, c order), s1 folded.
    w3f = (jnp.transpose(w3_hwio, (3, 0, 1, 2)).reshape(dim, kh * kw * Cin)
           * s1[:, None]).astype(jnp.bfloat16)
    # 1x1 conv weight -> (Cout, dim), s2 folded.
    w1f = (w1.T * s2[:, None]).astype(jnp.bfloat16)
    # residual 1x1 conv weight -> (Cout, skip_dim); its bias merges with BN2 shift.
    wuT = wu.T.astype(jnp.bfloat16)
    # full x2 bilinear upsample matrix (align_corners=True), transposed: (HW, OHW)
    U = np.kron(bilinear_matrix(H, 2 * H), bilinear_matrix(W, 2 * W))
    return {
        "w3f": w3f,
        "b1": b1.reshape(dim, 1).astype(jnp.float32),
        "w1f": w1f,
        "b2u": (b2 + bu).reshape(Cout, 1).astype(jnp.float32),
        "wuT": wuT,
        "ut": jnp.asarray(U.T, jnp.bfloat16),
    }


def cvt_decoder_block(x_nchw, skip_nchw, params):
    """CVT_DecoderBlock forward (upsample + residual + relu, BN eval mode).

    x_nchw:    (B, Cin, H, W)        f32 NCHW
    skip_nchw: (B, skip_dim, 2H, 2W) f32 NCHW
    returns    (B, Cout, 2H, 2W)     f32 NCHW
    """
    B, Cin, H, W = x_nchw.shape
    Bs, Cs, SH, SW = skip_nchw.shape
    OH, OW = 2 * H, 2 * W
    HW = H * W
    OHW = OH * OW
    assert Bs == B
    # F.interpolate(up, x.shape[-2:]) is the identity only for this case.
    assert (SH, SW) == (OH, OW), "skip spatial must equal 2*(H, W)"
    Cout, dim = params["w1f"].shape
    assert params["w3f"].shape == (dim, 9 * Cin)
    assert params["wuT"].shape == (Cout, Cs)
    assert params["ut"].shape == (HW, OHW)

    # kernel-friendly layouts: pure reshapes (no host-side transpose), bf16 cast
    x_in = x_nchw.reshape(B, Cin, HW).astype(jnp.bfloat16)
    skip_in = skip_nchw.reshape(B, Cs, OHW).astype(jnp.bfloat16)

    def kernel(x_ref, skip_ref, ut_ref, w3_ref, b1_ref, w1_ref, wu_ref,
               b2_ref, o_ref):
        # ---- bilinear x2 upsample (align_corners=True): one MXU matmul -------
        up = jnp.dot(x_ref[0], ut_ref[...],
                     preferred_element_type=jnp.float32)          # (Cin, OHW)

        # ---- 3x3 conv (pad=1) as one im2col matmul ---------------------------
        # taps via lane rolls (XLU) + edge masks emulating the zero padding.
        pos = lax.broadcasted_iota(jnp.int32, (Cin, OHW), 1)
        if (OW & (OW - 1)) == 0:
            col = pos & (OW - 1)
        else:
            col = pos % OW
        taps = []
        for sh in (-1, 0, 1):
            for sw in (-1, 0, 1):
                delta = sh * OW + sw
                if delta == 0:
                    taps.append(up.astype(jnp.bfloat16))
                    continue
                shifted = pltpu.roll(up, (-delta) % OHW, axis=1)
                conds = []
                if sh == -1:
                    conds.append(pos >= OW)
                if sh == 1:
                    conds.append(pos < (OH - 1) * OW)
                if sw == -1:
                    conds.append(col >= 1)
                if sw == 1:
                    conds.append(col < OW - 1)
                valid = conds[0]
                for extra in conds[1:]:
                    valid = valid & extra
                taps.append(jnp.where(valid, shifted, 0.0).astype(jnp.bfloat16))
        patches = jnp.concatenate(taps, axis=0)                   # (9Cin, OHW)

        h = jnp.dot(w3_ref[...], patches,
                    preferred_element_type=jnp.float32)           # (dim, OHW)
        h = jnp.maximum(h + b1_ref[...], 0.0).astype(jnp.bfloat16)

        # ---- 1x1 conv + residual 1x1 conv (+ folded biases) + final ReLU -----
        z = jnp.dot(w1_ref[...], h, preferred_element_type=jnp.float32)
        z = z + jnp.dot(wu_ref[...], skip_ref[0],
                        preferred_element_type=jnp.float32)
        z = jnp.maximum(z + b2_ref[...], 0.0)                     # (Cout, OHW)
        o_ref[0] = z.astype(o_ref.dtype)                          # 256-lane store

    grid_spec = pltpu.PrefetchScalarGridSpec(
        num_scalar_prefetch=0,
        grid=(B,),
        in_specs=[
            pl.BlockSpec((1, Cin, HW), lambda b: (b, 0, 0)),
            pl.BlockSpec((1, Cs, OHW), lambda b: (b, 0, 0)),
            pl.BlockSpec((HW, OHW), lambda b: (0, 0)),
            pl.BlockSpec((dim, 9 * Cin), lambda b: (0, 0)),
            pl.BlockSpec((dim, 1), lambda b: (0, 0)),
            pl.BlockSpec((Cout, dim), lambda b: (0, 0)),
            pl.BlockSpec((Cout, Cs), lambda b: (0, 0)),
            pl.BlockSpec((Cout, 1), lambda b: (0, 0)),
        ],
        out_specs=pl.BlockSpec((1, Cout, OHW), lambda b: (b, 0, 0)),
    )

    out = pl.pallas_call(
        kernel,
        out_shape=jax.ShapeDtypeStruct((B, Cout, OHW), jnp.float32),
        grid_spec=grid_spec,
        compiler_params=pltpu.CompilerParams(
            dimension_semantics=("parallel",)),
    )(x_in, skip_in, params["ut"], params["w3f"], params["b1"],
      params["w1f"], params["wuT"], params["b2u"])

    return out.reshape(B, Cout, OH, OW)                           # NCHW, free


def reference_forward(x, skip, Mh, Mw, w3_hwio, s1, b1, w1, s2, b2, wu, bu):
    """Pure-JAX f32 reference mirroring the PyTorch forward (BN eval mode)."""
    up = jnp.einsum("ph,qw,bchw->bcpq", Mh, Mw, x)
    y = lax.conv_general_dilated(
        up, w3_hwio, window_strides=(1, 1), padding="SAME",
        dimension_numbers=("NCHW", "HWIO", "NCHW"))
    y = jnp.maximum(y * s1[None, :, None, None] + b1[None, :, None, None], 0.0)
    y = jnp.einsum("bchw,cd->bdhw", y, w1)
    y = y * s2[None, :, None, None] + b2[None, :, None, None]
    r = jnp.einsum("bchw,cd->bdhw", skip, wu) + bu[None, :, None, None]
    return jnp.maximum(y + r, 0.0)


if __name__ == "__main__":
    # module hyper-params (small, consistent with the PyTorch module)
    B, Cin, H, W = 2, 8, 8, 8
    Cout, skip_dim, factor = 16, 8, 2
    dim = Cout // factor
    OH, OW = 2 * H, 2 * W
    eps = 1e-5

    key = jax.random.PRNGKey(0)
    ks = jax.random.split(key, 16)

    # inputs (PyTorch NCHW convention)
    x_nchw = jax.random.normal(ks[0], (B, Cin, H, W), jnp.float32)
    skip_nchw = jax.random.normal(ks[1], (B, skip_dim, OH, OW), jnp.float32)

    # parameters (deterministic synthetic init)
    w3 = jax.random.normal(ks[2], (3, 3, Cin, dim), jnp.float32) * 0.1   # HWIO
    g1 = jax.random.uniform(ks[3], (dim,), minval=0.5, maxval=1.5)
    be1 = jax.random.normal(ks[4], (dim,)) * 0.1
    rm1 = jax.random.normal(ks[5], (dim,)) * 0.1
    rv1 = jax.random.uniform(ks[6], (dim,), minval=0.5, maxval=1.5)
    w1 = jax.random.normal(ks[7], (dim, Cout), jnp.float32) * 0.1
    g2 = jax.random.uniform(ks[8], (Cout,), minval=0.5, maxval=1.5)
    be2 = jax.random.normal(ks[9], (Cout,)) * 0.1
    rm2 = jax.random.normal(ks[10], (Cout,)) * 0.1
    rv2 = jax.random.uniform(ks[11], (Cout,), minval=0.5, maxval=1.5)
    wu = jax.random.normal(ks[12], (skip_dim, Cout), jnp.float32) * 0.1
    bu = jax.random.normal(ks[13], (Cout,)) * 0.1

    params = prepare_params(w3, g1, be1, rm1, rv1, w1, g2, be2, rm2, rv2,
                            wu, bu, H, W, eps)

    out = jax.block_until_ready(cvt_decoder_block(x_nchw, skip_nchw, params))

    # f32 XLA reference
    s1 = g1 / jnp.sqrt(rv1 + eps)
    b1 = be1 - rm1 * s1
    s2 = g2 / jnp.sqrt(rv2 + eps)
    b2 = be2 - rm2 * s2
    Mh = jnp.asarray(bilinear_matrix(H, OH), jnp.float32)
    Mw = jnp.asarray(bilinear_matrix(W, OW), jnp.float32)
    ref = jax.block_until_ready(
        reference_forward(x_nchw, skip_nchw, Mh, Mw, w3, s1, b1, w1, s2, b2,
                          wu, bu))

    assert out.shape == (B, Cout, OH, OW), out.shape
    max_diff = float(jnp.max(jnp.abs(out - ref)))
    assert np.allclose(np.asarray(out), np.asarray(ref),
                       rtol=5e-2, atol=5e-2), ("max abs diff %g" % max_diff)
    print("KERNEL_OK")
</pallas_src>

<mosaic_0001>
module attributes {stable_mosaic.version = 11 : i64} {
  func.func @kernel(%arg0: i32, %arg1: memref<1x8x64xbf16, #tpu.memory_space<vmem>>, %arg2: memref<1x8x256xbf16, #tpu.memory_space<vmem>>, %arg3: memref<64x256xbf16, #tpu.memory_space<vmem>>, %arg4: memref<8x72xbf16, #tpu.memory_space<vmem>>, %arg5: memref<8x1xf32, #tpu.memory_space<vmem>>, %arg6: memref<16x8xbf16, #tpu.memory_space<vmem>>, %arg7: memref<16x8xbf16, #tpu.memory_space<vmem>>, %arg8: memref<16x1xf32, #tpu.memory_space<vmem>>, %arg9: memref<1x16x256xf32, #tpu.memory_space<vmem>>) attributes {dimension_semantics = [#tpu.dimension_semantics<parallel>], iteration_bounds = array<i64: 2>, scalar_prefetch = 0 : i64, scratch_operands = 0 : i64, tpu.core_type = #tpu.core_type<tc>, window_params = [{transform_indices = @transform_0, window_bounds = array<i64: 1, 8, 64>}, {transform_indices = @transform_1, window_bounds = array<i64: 1, 8, 256>}, {pipeline_mode = #tpu.pipeline_mode<synchronous>, transform_indices = @transform_2, window_bounds = array<i64: 64, 256>}, {pipeline_mode = #tpu.pipeline_mode<synchronous>, transform_indices = @transform_3, window_bounds = array<i64: 8, 72>}, {pipeline_mode = #tpu.pipeline_mode<synchronous>, transform_indices = @transform_4, window_bounds = array<i64: 8, 1>}, {pipeline_mode = #tpu.pipeline_mode<synchronous>, transform_indices = @transform_5, window_bounds = array<i64: 16, 8>}, {pipeline_mode = #tpu.pipeline_mode<synchronous>, transform_indices = @transform_6, window_bounds = array<i64: 16, 8>}, {pipeline_mode = #tpu.pipeline_mode<synchronous>, transform_indices = @transform_7, window_bounds = array<i64: 16, 1>}, {transform_indices = @transform_8, window_bounds = array<i64: 1, 16, 256>}]} {
    %c0 = arith.constant 0 : index
    %c0_0 = arith.constant 0 : index
    %c0_1 = arith.constant 0 : index
    %0 = vector.load %arg1[%c0, %c0_0, %c0_1] : memref<1x8x64xbf16, #tpu.memory_space<vmem>>, vector<1x8x64xbf16>
    %1 = vector.shape_cast %0 : vector<1x8x64xbf16> to vector<8x64xbf16>
    %c0_2 = arith.constant 0 : index
    %c0_3 = arith.constant 0 : index
    %2 = vector.load %arg3[%c0_2, %c0_3] : memref<64x256xbf16, #tpu.memory_space<vmem>>, vector<64x256xbf16>
    %cst = arith.constant dense<0.000000e+00> : vector<8x256xf32>
    %3 = tpu.matmul %1, %2, %cst {dimension_numbers = #tpu.dot_dimension_numbers<[1], [0], [0], [1], [0, 0, 1, 1], [], []>} : vector<8x64xbf16>, vector<64x256xbf16>, vector<8x256xf32> -> vector<8x256xf32>
    %4 = tpu.iota {dimensions = array<i32: 1>} : vector<8x256xi32>
    %c15_i32 = arith.constant 15 : i32
    %5 = vector.broadcast %c15_i32 : i32 to vector<8x256xi32>
    %6 = arith.andi %4, %5 : vector<8x256xi32>
    %c17_i32 = arith.constant 17 : i32
    %7 = tpu.dynamic_rotate %3 by %c17_i32 dim 1 : vector<8x256xf32>, i32 -> vector<8x256xf32>
    %c16_i32 = arith.constant 16 : i32
    %8 = vector.broadcast %c16_i32 : i32 to vector<8x256xi32>
    %9 = arith.cmpi sge, %4, %8 : vector<8x256xi32>
    %c1_i32 = arith.constant 1 : i32
    %10 = vector.broadcast %c1_i32 : i32 to vector<8x256xi32>
    %11 = arith.cmpi sge, %6, %10 : vector<8x256xi32>
    %12 = arith.andi %9, %11 : vector<8x256xi1>
    %cst_4 = arith.constant 0.000000e+00 : f32
    %13 = vector.broadcast %cst_4 : f32 to vector<8x256xf32>
    %14 = arith.select %12, %7, %13 : vector<8x256xi1>, vector<8x256xf32>
    %15 = arith.truncf %14 : vector<8x256xf32> to vector<8x256xbf16>
    %c16_i32_5 = arith.constant 16 : i32
    %16 = tpu.dynamic_rotate %3 by %c16_i32_5 dim 1 : vector<8x256xf32>, i32 -> vector<8x256xf32>
    %c16_i32_6 = arith.constant 16 : i32
    %17 = vector.broadcast %c16_i32_6 : i32 to vector<8x256xi32>
    %18 = arith.cmpi sge, %4, %17 : vector<8x256xi32>
    %cst_7 = arith.constant 0.000000e+00 : f32
    %19 = vector.broadcast %cst_7 : f32 to vector<8x256xf32>
    %20 = arith.select %18, %16, %19 : vector<8x256xi1>, vector<8x256xf32>
    %21 = arith.truncf %20 : vector<8x256xf32> to vector<8x256xbf16>
    %c15_i32_8 = arith.constant 15 : i32
    %22 = tpu.dynamic_rotate %3 by %c15_i32_8 dim 1 : vector<8x256xf32>, i32 -> vector<8x256xf32>
    %c16_i32_9 = arith.constant 16 : i32
    %23 = vector.broadcast %c16_i32_9 : i32 to vector<8x256xi32>
    %24 = arith.cmpi sge, %4, %23 : vector<8x256xi32>
    %c15_i32_10 = arith.constant 15 : i32
    %25 = vector.broadcast %c15_i32_10 : i32 to vector<8x256xi32>
    %26 = arith.cmpi slt, %6, %25 : vector<8x256xi32>
    %27 = arith.andi %24, %26 : vector<8x256xi1>
    %cst_11 = arith.constant 0.000000e+00 : f32
    %28 = vector.broadcast %cst_11 : f32 to vector<8x256xf32>
    %29 = arith.select %27, %22, %28 : vector<8x256xi1>, vector<8x256xf32>
    %30 = arith.truncf %29 : vector<8x256xf32> to vector<8x256xbf16>
    %c1_i32_12 = arith.constant 1 : i32
    %31 = tpu.dynamic_rotate %3 by %c1_i32_12 dim 1 : vector<8x256xf32>, i32 -> vector<8x256xf32>
    %c1_i32_13 = arith.constant 1 : i32
    %32 = vector.broadcast %c1_i32_13 : i32 to vector<8x256xi32>
    %33 = arith.cmpi sge, %6, %32 : vector<8x256xi32>
    %cst_14 = arith.constant 0.000000e+00 : f32
    %34 = vector.broadcast %cst_14 : f32 to vector<8x256xf32>
    %35 = arith.select %33, %31, %34 : vector<8x256xi1>, vector<8x256xf32>
    %36 = arith.truncf %35 : vector<8x256xf32> to vector<8x256xbf16>
    %37 = arith.truncf %3 : vector<8x256xf32> to vector<8x256xbf16>
    %c255_i32 = arith.constant 255 : i32
    %38 = tpu.dynamic_rotate %3 by %c255_i32 dim 1 : vector<8x256xf32>, i32 -> vector<8x256xf32>
    %c15_i32_15 = arith.constant 15 : i32
    %39 = vector.broadcast %c15_i32_15 : i32 to vector<8x256xi32>
    %40 = arith.cmpi slt, %6, %39 : vector<8x256xi32>
    %cst_16 = arith.constant 0.000000e+00 : f32
    %41 = vector.broadcast %cst_16 : f32 to vector<8x256xf32>
    %42 = arith.select %40, %38, %41 : vector<8x256xi1>, vector<8x256xf32>
    %43 = arith.truncf %42 : vector<8x256xf32> to vector<8x256xbf16>
    %c241_i32 = arith.constant 241 : i32
    %44 = tpu.dynamic_rotate %3 by %c241_i32 dim 1 : vector<8x256xf32>, i32 -> vector<8x256xf32>
    %c240_i32 = arith.constant 240 : i32
    %45 = vector.broadcast %c240_i32 : i32 to vector<8x256xi32>
    %46 = arith.cmpi slt, %4, %45 : vector<8x256xi32>
    %c1_i32_17 = arith.constant 1 : i32
    %47 = vector.broadcast %c1_i32_17 : i32 to vector<8x256xi32>
    %48 = arith.cmpi sge, %6, %47 : vector<8x256xi32>
    %49 = arith.andi %46, %48 : vector<8x256xi1>
    %cst_18 = arith.constant 0.000000e+00 : f32
    %50 = vector.broadcast %cst_18 : f32 to vector<8x256xf32>
    %51 = arith.select %49, %44, %50 : vector<8x256xi1>, vector<8x256xf32>
    %52 = arith.truncf %51 : vector<8x256xf32> to vector<8x256xbf16>
    %c240_i32_19 = arith.constant 240 : i32
    %53 = tpu.dynamic_rotate %3 by %c240_i32_19 dim 1 : vector<8x256xf32>, i32 -> vector<8x256xf32>
    %c240_i32_20 = arith.constant 240 : i32
    %54 = vector.broadcast %c240_i32_20 : i32 to vector<8x256xi32>
    %55 = arith.cmpi slt, %4, %54 : vector<8x256xi32>
    %cst_21 = arith.constant 0.000000e+00 : f32
    %56 = vector.broadcast %cst_21 : f32 to vector<8x256xf32>
    %57 = arith.select %55, %53, %56 : vector<8x256xi1>, vector<8x256xf32>
    %58 = arith.truncf %57 : vector<8x256xf32> to vector<8x256xbf16>
    %c239_i32 = arith.constant 239 : i32
    %59 = tpu.dynamic_rotate %3 by %c239_i32 dim 1 : vector<8x256xf32>, i32 -> vector<8x256xf32>
    %c240_i32_22 = arith.constant 240 : i32
    %60 = vector.broadcast %c240_i32_22 : i32 to vector<8x256xi32>
    %61 = arith.cmpi slt, %4, %60 : vector<8x256xi32>
    %c15_i32_23 = arith.constant 15 : i32
    %62 = vector.broadcast %c15_i32_23 : i32 to vector<8x256xi32>
    %63 = arith.cmpi slt, %6, %62 : vector<8x256xi32>
    %64 = arith.andi %61, %63 : vector<8x256xi1>
    %cst_24 = arith.constant 0.000000e+00 : f32
    %65 = vector.broadcast %cst_24 : f32 to vector<8x256xf32>
    %66 = arith.select %64, %59, %65 : vector<8x256xi1>, vector<8x256xf32>
    %67 = arith.truncf %66 : vector<8x256xf32> to vector<8x256xbf16>
    %68 = tpu.concatenate %15, %21, %30, %36, %37, %43, %52, %58, %67 in 0 : vector<8x256xbf16>, vector<8x256xbf16>, vector<8x256xbf16>, vector<8x256xbf16>, vector<8x256xbf16>, vector<8x256xbf16>, vector<8x256xbf16>, vector<8x256xbf16>, vector<8x256xbf16> -> vector<72x256xbf16>
    %c0_25 = arith.constant 0 : index
    %c0_26 = arith.constant 0 : index
    %69 = vector.load %arg4[%c0_25, %c0_26] : memref<8x72xbf16, #tpu.memory_space<vmem>>, vector<8x72xbf16>
    %cst_27 = arith.constant dense<0.000000e+00> : vector<8x256xf32>
    %70 = tpu.matmul %69, %68, %cst_27 {dimension_numbers = #tpu.dot_dimension_numbers<[1], [0], [0], [1], [0, 0, 1, 1], [], []>} : vector<8x72xbf16>, vector<72x256xbf16>, vector<8x256xf32> -> vector<8x256xf32>
    %c0_28 = arith.constant 0 : index
    %c0_29 = arith.constant 0 : index
    %71 = vector.load %arg5[%c0_28, %c0_29] : memref<8x1xf32, #tpu.memory_space<vmem>>, vector<8x1xf32>
    %72 = vector.broadcast %71 : vector<8x1xf32> to vector<8x256xf32>
    %73 = arith.addf %70, %72 : vector<8x256xf32>
    %cst_30 = arith.constant 0.000000e+00 : f32
    %74 = vector.broadcast %cst_30 : f32 to vector<8x256xf32>
    %75 = arith.maximumf %73, %74 : vector<8x256xf32>
    %76 = arith.truncf %75 : vector<8x256xf32> to vector<8x256xbf16>
    %c0_31 = arith.constant 0 : index
    %c0_32 = arith.constant 0 : index
    %77 = vector.load %arg6[%c0_31, %c0_32] : memref<16x8xbf16, #tpu.memory_space<vmem>>, vector<16x8xbf16>
    %cst_33 = arith.constant dense<0.000000e+00> : vector<16x256xf32>
    %78 = tpu.matmul %77, %76, %cst_33 {dimension_numbers = #tpu.dot_dimension_numbers<[1], [0], [0], [1], [0, 0, 1, 1], [], []>} : vector<16x8xbf16>, vector<8x256xbf16>, vector<16x256xf32> -> vector<16x256xf32>
    %c0_34 = arith.constant 0 : index
    %c0_35 = arith.constant 0 : index
    %79 = vector.load %arg7[%c0_34, %c0_35] : memref<16x8xbf16, #tpu.memory_space<vmem>>, vector<16x8xbf16>
    %c0_36 = arith.constant 0 : index
    %c0_37 = arith.constant 0 : index
    %c0_38 = arith.constant 0 : index
    %80 = vector.load %arg2[%c0_36, %c0_37, %c0_38] : memref<1x8x256xbf16, #tpu.memory_space<vmem>>, vector<1x8x256xbf16>
    %81 = vector.shape_cast %80 : vector<1x8x256xbf16> to vector<8x256xbf16>
    %cst_39 = arith.constant dense<0.000000e+00> : vector<16x256xf32>
    %82 = tpu.matmul %79, %81, %cst_39 {dimension_numbers = #tpu.dot_dimension_numbers<[1], [0], [0], [1], [0, 0, 1, 1], [], []>} : vector<16x8xbf16>, vector<8x256xbf16>, vector<16x256xf32> -> vector<16x256xf32>
    %83 = arith.addf %78, %82 : vector<16x256xf32>
    %c0_40 = arith.constant 0 : index
    %c0_41 = arith.constant 0 : index
    %84 = vector.load %arg8[%c0_40, %c0_41] : memref<16x1xf32, #tpu.memory_space<vmem>>, vector<16x1xf32>
    %85 = vector.broadcast %84 : vector<16x1xf32> to vector<16x256xf32>
    %86 = arith.addf %83, %85 : vector<16x256xf32>
    %cst_42 = arith.constant 0.000000e+00 : f32
    %87 = vector.broadcast %cst_42 : f32 to vector<16x256xf32>
    %88 = arith.maximumf %86, %87 : vector<16x256xf32>
    %c0_43 = arith.constant 0 : index
    %c0_44 = arith.constant 0 : index
    %c0_45 = arith.constant 0 : index
    %89 = vector.load %arg9[%c0_43, %c0_44, %c0_45] : memref<1x16x256xf32, #tpu.memory_space<vmem>>, vector<1x16x256xf32>
    %90 = vector.shape_cast %89 : vector<1x16x256xf32> to vector<16x256xf32>
    %91 = vector.shape_cast %88 : vector<16x256xf32> to vector<1x16x256xf32>
    tpu.vector_store %arg9[%c0_43, %c0_44, %c0_45], %91 {strides = array<i32>} : memref<1x16x256xf32, #tpu.memory_space<vmem>>, vector<1x16x256xf32>,
    return
  }
  func.func @transform_0(%arg0: i32) -> (i32, i32, i32) {
    %c0_i32 = arith.constant 0 : i32
    %c0_i32_0 = arith.constant 0 : i32
    %c0_i32_1 = arith.constant 0 : i32
    return %arg0, %c0_i32, %c0_i32_0 : i32, i32, i32
  }
  func.func @transform_1(%arg0: i32) -> (i32, i32, i32) {
    %c0_i32 = arith.constant 0 : i32
    %c0_i32_0 = arith.constant 0 : i32
    %c0_i32_1 = arith.constant 0 : i32
    return %arg0, %c0_i32, %c0_i32_0 : i32, i32, i32
  }
  func.func @transform_2(%arg0: i32) -> (i32, i32) {
    %c0_i32 = arith.constant 0 : i32
    %c0_i32_0 = arith.constant 0 : i32
    %c0_i32_1 = arith.constant 0 : i32
    return %c0_i32, %c0_i32_0 : i32, i32
  }
  func.func @transform_3(%arg0: i32) -> (i32, i32) {
    %c0_i32 = arith.constant 0 : i32
    %c0_i32_0 = arith.constant 0 : i32
    %c0_i32_1 = arith.constant 0 : i32
    return %c0_i32, %c0_i32_0 : i32, i32
  }
  func.func @transform_4(%arg0: i32) -> (i32, i32) {
    %c0_i32 = arith.constant 0 : i32
    %c0_i32_0 = arith.constant 0 : i32
    %c0_i32_1 = arith.constant 0 : i32
    return %c0_i32, %c0_i32_0 : i32, i32
  }
  func.func @transform_5(%arg0: i32) -> (i32, i32) {
    %c0_i32 = arith.constant 0 : i32
    %c0_i32_0 = arith.constant 0 : i32
    %c0_i32_1 = arith.constant 0 : i32
    return %c0_i32, %c0_i32_0 : i32, i32
  }
  func.func @transform_6(%arg0: i32) -> (i32, i32) {
    %c0_i32 = arith.constant 0 : i32
    %c0_i32_0 = arith.constant 0 : i32
    %c0_i32_1 = arith.constant 0 : i32
    return %c0_i32, %c0_i32_0 : i32, i32
  }
  func.func @transform_7(%arg0: i32) -> (i32, i32) {
    %c0_i32 = arith.constant 0 : i32
    %c0_i32_0 = arith.constant 0 : i32
    %c0_i32_1 = arith.constant 0 : i32
    return %c0_i32, %c0_i32_0 : i32, i32
  }
  func.func @transform_8(%arg0: i32) -> (i32, i32, i32) {
    %c0_i32 = arith.constant 0 : i32
    %c0_i32_0 = arith.constant 0 : i32
    %c0_i32_1 = arith.constant 0 : i32
    return %arg0, %c0_i32, %c0_i32_0 : i32, i32, i32
  }
}

</mosaic_0001>

<bundles_post_ra>
// kernel: tpu_custom_call.1
= control target key start
LH: loop header
LB: loop body
LE: loop exit
PB: predicated region body
PF: predicated region fallthrough
CT: control target
= control target key end

     0   :  { %13 = vsyncpa [#allocation3], 0  ;;  %s1477_s0 = inlined_call_operand.vmem [shape: bf16[2,8,64], index: 0, kind: input, shape index: {}]   ;;  %s1478_s1 = inlined_call_operand.vmem [shape: bf16[2,8,256], index: 1, kind: input, shape index: {}]   ;;  %s1479_s2 = inlined_call_operand.hbm [shape: bf16[64,256], index: 2, kind: input, shape index: {}]   ;;  %s1480_s3 = inlined_call_operand.vmem [shape: bf16[8,72], index: 3, kind: input, shape index: {}]   ;;  %s1481_s4 = inlined_call_operand.vmem [shape: f32[8,1], index: 4, kind: input, shape index: {}]   ;;  %s1482_s5 = inlined_call_operand.vmem [shape: bf16[16,8], index: 5, kind: input, shape index: {}]   ;;  %s1483_s6 = inlined_call_operand.vmem [shape: bf16[16,8], index: 6, kind: input, shape index: {}]   ;;  %s1484_s7 = inlined_call_operand.vmem [shape: f32[16,1], index: 7, kind: input, shape index: {}]   ;;  %s1485_s8 = inlined_call_operand.hbm [shape: f32[2,16,256], index: 8, kind: output, shape index: {}]  }
   0x1   :  { %14 = vsyncpa [#allocation4], 0 }
   0x2   :  { %16 = vsyncpa [#allocation4 + $0x1], 0  ;;  %s1202_s27 = smov 0   ;;  %s1204_s28 = smov 0  }
   0x3   :  { %s1206_s29 = smov 0   ;;  %s1208_s30 = smov 0  }
   0x4 LB: > { %s1223_s9 = sadd.s32 4294967295, %s1142_s30   ;;  %s866_s10 = sadd.s32 4294967294, %s1142_s30   ;;  %s1142_s30 = sphi %s1208_s30, %s1507_s30   ;;  %s1138_s29 = sphi %s1206_s29, %s1506_s29   ;;  %s1134_s28 = sphi %s1204_s28, %s1505_s28   ;;  %s1130_s27 = sphi %s1202_s27, %s1504_s27  }
   0x5   : > { %s1227_s11 = sadd.s32 1, %s1142_s30   ;;  %s207_s12 = sadd.s32 1, %s1138_s29 }
   0x6   : > { %s204_s13 = ssub.s32 %s1142_s30, %s1227_s11  ;;  %p217_p0 = scmp.ne.s32.totalorder %s1138_s29, %s1134_s28 }
   0x7   : > { %p205_p1 = scmp.eq.s32.totalorder %s204_s13, 0  ;;  %p218_p2 = scmp.eq.s32.totalorder %s1223_s9, 1 }
   0x8   : > { %p223_p3 = scmp.ne.s32.totalorder %s1134_s28, %s1130_s27  ;;  %p224_p4 = scmp.eq.s32.totalorder %s866_s10, 1 }
   0x9   : > { %s1238_s14 = scalar_select %p205_p1, %s1138_s29, %s207_s12  }
   0xa   : > { %p1240_p5 = por %p218_p2, %p217_p0  ;;  %p1244_p6 = por %p224_p4, %p223_p3 }
   0xb   : > { %p867_p7 = scmp.ge.s32.totalorder %s1142_s30, 1  ;;  %p231_p8 = scmp.lt.s32.totalorder %s1142_s30, 3 }
   0xc   : > { %p955_p9 = scmp.eq.s32.totalorder %s1223_s9, 0  ;;  %s242_s19 = sshll.u32 %s1479_s2, 4  ;;  %s243_s19 = int_to_ptr.hbm [resolvable:$true] %s242_s19 }
   0xd   : > { %p232_p10 = pnand %p867_p7, %p231_p8  ;;  %s1144_s20 = smov [#allocation2]  }
   0xe   : > { %s244_s21 = sshll.u32 %s1144_s20, 4  ;;  %s1145_s22 = smov 128   ;;  %s245_s21 = int_to_ptr.vmem [resolvable:$true] %s244_s21 }
   0xf   : > { %p947_p11 = pneg %p232_p10  ;;  %s1146_s23 = smov 8  }
  0x10   : > { %290 = sbr.rel (%p232_p10) target bundleno = 612 (0x264), region = 52 }
  0x11   : > { %p948_p12 = pnand %p955_p9, %p947_p11 }
  0x13   : > { %950 = dma.hbm_to_vmem [thread:$0]  (!%p948_p12), %s243_s19, 1024, %s245_s21, [#allocation3], %s1145_s22, %s1145_s22, %s1146_s23  }
  0x15   : > { %1121 = dma.done.wait (%p955_p9), [#allocation3], 1024  }
  0x16   : > { %1123 = vsyncadd (%p955_p9), [#allocation3], 4294966272  ;;  %p329_p13 = scmp.lt.s32.totalorder %s1223_s9, 1  ;;  %v902_v0 = vld [vmem:[#allocation2 + $0x30] sm:$0xf]  ;;  %vm388_vm0 = vcmask 523264   ;;  %v418_v31 = vlaneseq }
  0x17   : > { %v937_v1 = vld [vmem:[#allocation2 + $0x34] sm:$0xf0]  ;;  %v936_v2 = vld [vmem:[#allocation2 + $0x34] sm:$0xf]  ;;  %v904_v4 = vld [vmem:[#allocation2 + $0x38] sm:$0xf0] }
  0x18   : > { %v903_v3 = vor.u32 %v937_v1, %v902_v0  ;;  %v894_v5 = vld [vmem:[#allocation2 + $0x20] sm:$0xf]  ;;  %v935_v6 = vld [vmem:[#allocation2 + $0x24] sm:$0xf0]  ;;  %v907_v7 = vor.u32 %v936_v2, %v904_v4  ;;  %v934_v8 = vld [vmem:[#allocation2 + $0x24] sm:$0xf] }
  0x19   : > { %v896_v9 = vld [vmem:[#allocation2 + $0x28] sm:$0xf0]  ;;  %v895_v10 = vor.u32 %v935_v6, %v894_v5  ;;  %v886_v12 = vld [vmem:[#allocation2 + $0x10] sm:$0xf]  ;;  %v933_v13 = vld [vmem:[#allocation2 + $0x14] sm:$0xf0] }
  0x1a   : > { %396 = vmatpush.bf16.msra.mxu0 %v903_v3  ;;  %409 = vmatpush.bf16.msra.mxu1 %v907_v7  ;;  %v899_v11 = vor.u32 %v934_v8, %v896_v9  ;;  %v932_v14 = vld [vmem:[#allocation2 + $0x14] sm:$0xf]  ;;  %v888_v15 = vld [vmem:[#allocation2 + $0x18] sm:$0xf0]  ;;  %s1264_s24 = scalar_select %p329_p13, %s1223_s9, 1  ;;  %v887_v16 = vor.u32 %v933_v13, %v886_v12  ;;  %v1273_v33 = vand.u32 127, %v418_v31 }
  0x1b   : > { %v891_v17 = vor.u32 %v932_v14, %v888_v15  ;;  %v878_v18 = vld [vmem:[#allocation2] sm:$0xf]  ;;  %v931_v19 = vld [vmem:[#allocation2 + $0x4] sm:$0xf0]  ;;  %v930_v20 = vld [vmem:[#allocation2 + $0x4] sm:$0xf] }
  0x1c   : > { %v880_v21 = vld [vmem:[#allocation2 + $0x8] sm:$0xf0]  ;;  %s873_s25 = sshll.u32 %s1264_s24, 2  ;;  %v879_v22 = vor.u32 %v931_v19, %v878_v18  ;;  %s1147_s13 = smov 15   ;;  %v420_v34 = vadd.s32 128, %v1273_v33  ;;  %v421_v37 = vand.u32 15, %v1273_v33 }
  0x1d   : > { %v883_v23 = vor.u32 %v930_v20, %v880_v21  ;;  %s332_s12 = scalar_lea.vmem %s1477_s0, %s873_s25  ;;  %s1148_s17 = smov 112   ;;  %vm430_vm1 = vcmp.ge.s32.totalorder %v1273_v33, 16  ;;  %vm453_vm2 = vcmp.lt.s32.totalorder %v1273_v33, 15  ;;  %vm467_vm5 = vcmp.lt.s32.totalorder %v1273_v33, 1  ;;  %v599_v0 = vld [vmem:[%s1481_s4] sm:$0xff] }
  0x1e   : > { %397 = vmatpush.bf16.msra.mxu0 %v895_v10  ;;  %410 = vmatpush.bf16.msra.mxu1 %v899_v11  ;;  %v339_v24 = vld [vmem:[%s332_s12] sm:$0xf]  ;;  %s1149_s18 = smov 111   ;;  %s1150_s19 = smov 1   ;;  %v422_v35 = vand.u32 15, %v420_v34  ;;  %vm492_vm3 = vcmp.lt.s32.totalorder %v420_v34, 240 }
  0x1f   : > { %s1151_s20 = smov 127   ;;  %s1152_s21 = smov 113   ;;  %vm502_vm6 = vcmp.lt.s32.totalorder %v1273_v33, 112  ;;  %vm512_vm7 = vcmp.lt.s32.totalorder %v1273_v33, 111  ;;  %vm1286_vm8 = vcmp.lt.s32.totalorder %v421_v37, 15  ;;  %vm1290_vm9 = vcmp.ge.s32.totalorder %v421_v37, 1 }
  0x20   : > { %s1153_s22 = smov 16   ;;  %s1154_s23 = smov 17   ;;  %vm1279_vm4 = vcmp.lt.s32.totalorder %v422_v35, 15  ;;  %vm1301_vm11 = vcmp.ge.s32.totalorder %v422_v35, 1  ;;  %vm1322_vm12 = vmand %vm430_vm1, %vm1286_vm8  ;;  %v1155_v5 = vmov 0   ;;  %vm478_vm13 = vcmp.lt.s32.totalorder %v1273_v33, 127 }
  0x21   : > { %vm1297_vm10 = vmand %vm492_vm3, %vm1279_vm4  ;;  %1043 = vset.pattern.permute.xlu2 %v1155_v5  ;;  %1045 = vset.pattern.permute.xlu1 %v1155_v5  ;;  %vm565_vm14 = vcmask 1043456   ;;  %vm488_vm15 = vcmp.lt.s32.totalorder %v1273_v33, 113 }
  0x22   : > { %398 = vmatpush.bf16.msra.mxu0 %v887_v16  ;;  %411 = vmatpush.bf16.msra.mxu1 %v891_v17 }
  0x23   : > { %1044 = vset.pattern.permute.xlu0 %v1155_v5 }
  0x26   : > { %399 = vmatpush.bf16.msra.mxu0 %v879_v22  ;;  %412 = vmatpush.bf16.msra.mxu1 %v883_v23 }
  0x29   : > { %908 = vmatmul.msk.bf16.vlgmr.msra.gmra.mxu0 %vm388_vm0, %v339_v24  ;;  %909 = vmatmul.msk.bf16.vlgmr.msra.gmra.mxu1 %vm388_vm0, %v339_v24  ;;  %vm1353_vm0 = vmand %vm492_vm3, %vm1301_vm11 }
  0xa6   : > { %v401_v25 = vpop.f32.mrf.mxu0  ;;  %v414_v26 = vpop.f32.mrf.mxu1 }
  0xa7   : > { %v1023_v27 = vpack.i.bf16 %v414_v26, %v401_v25  ;;  %v1270_v28 = vpack.c.bf16 %v414_v26, %v401_v25 }
  0xa9   : > { %1024 = vrot.lane.b32.xlu2 %v1023_v27, %s1147_s13  ;;  %1014 = vrot.lane.b32.xlu1 %v1023_v27, %s1148_s17  ;;  %v541_v7 = vunpack.c.l.b16 %v1270_v28  ;;  %s929_s13 = sshll.u32 %s1264_s24, 3 }
  0xaa   : > { %1004 = vrot.lane.b32.xlu0 %v1023_v27, %s1149_s18  ;;  %s940_s18 = sshll.u32 %s1223_s9, 5 }
  0xab   : > { %s776_s24 = scalar_lea.hbm %s1485_s8, %s940_s18  ;;  %s1096_s18 = scalar_lea.hbm %s1485_s8, 64 }
  0xac   : > { %s779_s9 = sshll.u32 %s776_s24, 4  ;;  %s780_s9 = int_to_ptr.hbm [resolvable:$true] %s779_s9 }
  0xad   : > { %s1090_s26 = sshra.s32 %s780_s9, 4  ;;  %s1091_s26 = int_to_ptr.hbm [resolvable:$true] %s1090_s26 }
  0xae   : > { %v403_v29 = vpop.f32.mrf.mxu0  ;;  %v416_v30 = vpop.f32.mrf.mxu1  ;;  %s1092_s10 = scalar_lea.hbm %s1091_s26, 32  ;;  %p1097_p3 = scmp.lt.s32.totalorder %s1091_s26, %s1485_s8 }
  0xaf   : > { %p1093_p0 = scmp.ne.s32.totalorder %s1091_s26, %s1092_s10  ;;  %p1098_p4 = scmp.lt.s32.totalorder %s1096_s18, %s1092_s10 }
  0xb1   : > { %1029 = vrot.lane.b32.xlu2 %v1023_v27, %s1150_s19  ;;  %1019 = vrot.lane.b32.xlu1 %v1023_v27, %s1151_s20  ;;  %s337_s19 = scalar_lea.vmem %s1478_s1, %s929_s13  ;;  %s326_s13 = sand.u32 1, %s1134_s28  }
  0xb2   : > { %1009 = vrot.lane.b32.xlu0 %v1023_v27, %s1152_s21  ;;  %s872_s17 = sshll.u32 %s326_s13, 5  ;;  %s765_s25 = scalar_lea.sflag [#allocation4], %s326_s13 }
  0xb3   : > { %p1094_p1 = pnand %p1093_p0, %p1240_p5  ;;  %p1099_p7 = por %p1098_p4, %p1097_p3 }
  0xb5   : > { %p1095_p2 = pneg %p1094_p1 }
  0xb7   : > { %p1100_p8 = pnand %p1099_p7, %p1095_p2 }
  0xb9   : > { %1039 = vrot.lane.b32.xlu1 %v1023_v27, %s1153_s22  ;;  %602 = vperm.xlu2 %1043, %v599_v0  }
  0xba   : > { %1034 = vrot.lane.b32.xlu0 %v1023_v27, %s1154_s23 }
 0x103   : > { %v1025_v32 = vpop.permute.xlu2 %1024 }
 0x104   : > { %v1027_v42 = vunpack.i.h.bf16 %v1025_v32  ;;  %v1026_v43 = vunpack.i.l.bf16 %v1025_v32 }
 0x106   : > { %v455_v61 = vsel %vm453_vm2, %v1027_v42, %v1026_v43  ;;  %v454_v1 = vsel %vm453_vm2, %v1026_v43, %v1027_v42  ;;  %vm443_vm2 = vcmp.lt.s32.totalorder %v1273_v33, 16 }
 0x107   : > { %v460_v8 = vsel %vm1322_vm12, %v455_v61, 0.0  ;;  %v461_v12 = vsel %vm1279_vm4, %v454_v1, 0.0 }
 0x10b   : > { %v1030_v36 = vpop.permute.xlu2 %1029 }
 0x10c   : > { %v1032_v38 = vunpack.i.h.bf16 %v1030_v36  ;;  %v1031_v39 = vunpack.i.l.bf16 %v1030_v36 }
 0x10e   : > { %v468_v53 = vsel %vm467_vm5, %v1031_v39, %v1032_v38  ;;  %v469_v54 = vsel %vm467_vm5, %v1032_v38, %v1031_v39  ;;  %v542_v38 = vunpack.c.h.b16 %v1270_v28  ;;  %v462_v39 = vpack.c.bf16 %v461_v12, %v460_v8 }
 0x10f   : > { %v470_v2 = vsel %vm1290_vm9, %v469_v54, 0.0  ;;  %v471_v3 = vsel %vm1301_vm11, %v468_v53, 0.0  ;;  %vm660_vm5 = vcmask 64512  }
 0x110   : > { %v1348_v16 = vpack.c.bf16 %v471_v3, %v470_v2  ;;  %v531_v8 = vunpack.c.l.b16 %v462_v39 }
 0x112   : > { %v536_v40 = vunpack.c.l.b16 %v1348_v16 }
 0x114   : > { %v538_v12 = vpack.c.b16 %v536_v40, %v536_v40 }
 0x11b   : > { %v1015_v41 = vpop.permute.xlu1 %1014 }
 0x11c   : > { %v1017_v44 = vunpack.i.h.bf16 %v1015_v41  ;;  %v1016_v45 = vunpack.i.l.bf16 %v1015_v41  ;;  %v1005_v46 = vpop.permute.xlu0 %1004  ;;  %v537_v41 = vunpack.c.h.b16 %v1348_v16 }
 0x11d   : > { %v1007_v49 = vunpack.i.h.bf16 %v1005_v46  ;;  %v1006_v50 = vunpack.i.l.bf16 %v1005_v46 }
 0x11e   : > { %v504_v55 = vsel %vm502_vm6, %v1017_v44, %v1016_v45  ;;  %v503_v56 = vsel %vm502_vm6, %v1016_v45, %v1017_v44 }
 0x11f   : > { %v506_v57 = vsel %vm492_vm3, %v504_v55, 0.0  ;;  %v513_v58 = vsel %vm512_vm7, %v1006_v50, %v1007_v49  ;;  %v514_v59 = vsel %vm512_vm7, %v1007_v49, %v1006_v50  ;;  %vm427_vm3 = vcmp.lt.s32.totalorder %v1273_v33, 17 }
 0x120   : > { %v517_v62 = vsel %vm1286_vm8, %v513_v58, 0.0  ;;  %v518_v63 = vsel %vm1297_vm10, %v514_v59, 0.0  ;;  %v507_v6 = vpack.c.bf16 %v506_v57, %v503_v56 }
 0x121   : > { %v519_v4 = vpack.c.bf16 %v518_v63, %v517_v62 }
 0x122   : > { %v556_v24 = vunpack.c.l.b16 %v507_v6  ;;  %v557_v25 = vunpack.c.h.b16 %v507_v6  ;;  %v543_v6 = vpack.c.b16 %v541_v7, %v541_v7 }
 0x123   : > { %v1020_v9 = vpop.permute.xlu1 %1019  ;;  %v561_v10 = vunpack.c.l.b16 %v519_v4  ;;  %v562_v11 = vunpack.c.h.b16 %v519_v4 }
 0x124   : > { %v1022_v13 = vunpack.i.h.bf16 %v1020_v9  ;;  %v1021_v14 = vunpack.i.l.bf16 %v1020_v9  ;;  %v1010_v15 = vpop.permute.xlu0 %1009  ;;  %v558_v51 = vpack.c.b16 %v556_v24, %v556_v24  ;;  %v559_v53 = vpack.c.b16 %v557_v25, %v557_v25 }
 0x125   : > { %v1012_v18 = vunpack.i.h.bf16 %v1010_v15  ;;  %v1011_v19 = vunpack.i.l.bf16 %v1010_v15  ;;  %v563_v20 = vpack.c.b16 %v561_v10, %v561_v10  ;;  %v564_v21 = vpack.c.b16 %v562_v11, %v562_v11 }
 0x126   : > { %v479_v22 = vsel %vm478_vm13, %v1021_v14, %v1022_v13  ;;  %v480_v23 = vsel %vm478_vm13, %v1022_v13, %v1021_v14  ;;  %v544_v9 = vpack.c.b16 %v542_v38, %v542_v38  ;;  %v532_v10 = vunpack.c.h.b16 %v462_v39  ;;  %v740_v38 = vld [vmem:[%s1484_s7] sm:$0xff]  ;;  %v603_v39 = vpop.permute.xlu2 %602 }
 0x127   : > { %v481_v26 = vsel %vm1286_vm8, %v479_v22, 0.0  ;;  %v482_v27 = vsel %vm1279_vm4, %v480_v23, 0.0  ;;  %v489_v29 = vsel %vm488_vm15, %v1011_v19, %v1012_v18  ;;  %v490_v30 = vsel %vm488_vm15, %v1012_v18, %v1011_v19  ;;  %vm1384_vm4 = vmand %vm430_vm1, %vm1290_vm9  ;;  %744 = vperm.xlu0 %1044, %v740_v38  }
 0x128   : > { %v495_v31 = vsel %vm1290_vm9, %v489_v29, 0.0  ;;  %v496_v32 = vsel %vm1353_vm0, %v490_v30, 0.0  ;;  %v610_v34 = vsel %vm565_vm14, %v563_v20, 0  ;;  %v613_v35 = vsel %vm565_vm14, %v564_v21, 0 }
 0x129   : > { %618 = vmatpush.bf16.msra.mxu2 %v610_v34  ;;  %631 = vmatpush.bf16.msra.mxu3 %v613_v35  ;;  %v497_v36 = vpack.c.bf16 %v496_v32, %v495_v31  ;;  %v483_v37 = vpack.c.bf16 %v482_v27, %v481_v26  ;;  %v539_v15 = vpack.c.b16 %v537_v41, %v537_v41  ;;  %v598_v26 = vld [vmem:[%s1480_s3] sm:$0xf] }
 0x12a   : > { %v533_v18 = vpack.c.b16 %v531_v8, %v531_v8  ;;  %v534_v28 = vpack.c.b16 %v532_v10, %v532_v10  ;;  %v649_v27 = vld [vmem:[%s337_s19] sm:$0xff]  ;;  %s328_s19 = scalar_lea.vmem [#allocation5], %s872_s17 }
 0x12b   : > { %v1040_v42 = vpop.permute.xlu1 %1039  ;;  %v551_v43 = vunpack.c.l.b16 %v497_v36  ;;  %v552_v44 = vunpack.c.h.b16 %v497_v36  ;;  %v546_v45 = vunpack.c.l.b16 %v483_v37  ;;  %v547_v46 = vunpack.c.h.b16 %v483_v37  ;;  %v939_v36 = vld [vmem:[%s1483_s6] sm:$0xff]  ;;  %v741_v37 = vld [vmem:[%s1484_s7 + $0x8] sm:$0xff]  ;;  %s777_s23 = sshll.u32 %s328_s19, 4  ;;  %s778_s23 = int_to_ptr.vmem [resolvable:$true] %s777_s23 }
 0x12c   : > { %v1042_v47 = vunpack.i.h.bf16 %v1040_v42  ;;  %v1041_v49 = vunpack.i.l.bf16 %v1040_v42  ;;  %v1035_v50 = vpop.permute.xlu0 %1034  ;;  %v576_v7 = vsel %vm565_vm14, %v533_v18, %v538_v12  ;;  %v580_v21 = vsel %vm565_vm14, %v534_v28, %v539_v15  ;;  %749 = vperm.xlu1 %1045, %v741_v37  }
 0x12d   : > { %v1037_v55 = vunpack.i.h.bf16 %v1035_v50  ;;  %v1036_v56 = vunpack.i.l.bf16 %v1035_v50  ;;  %v553_v57 = vpack.c.b16 %v551_v43, %v551_v43  ;;  %v554_v58 = vpack.c.b16 %v552_v44, %v552_v44  ;;  %v938_v50 = vld [vmem:[%s1482_s5] sm:$0xff] }
 0x12e   : > { %v444_v59 = vsel %vm443_vm2, %v1041_v49, %v1042_v47  ;;  %v445_v60 = vsel %vm443_vm2, %v1042_v47, %v1041_v49  ;;  %v548_v61 = vpack.c.b16 %v546_v45, %v546_v45  ;;  %v549_v62 = vpack.c.b16 %v547_v46, %v547_v46 }
 0x12f   : > { %v446_v48 = vsel %vm430_vm1, %v445_v60, 0.0  ;;  %v428_v63 = vsel %vm427_vm3, %v1036_v56, %v1037_v55  ;;  %v429_v0 = vsel %vm427_vm3, %v1037_v55, %v1036_v56  ;;  %v592_v1 = vsel %vm565_vm14, %v553_v57, %v558_v51 }
 0x130   : > { %v448_v2 = vpack.c.bf16 %v444_v59, %v446_v48  ;;  %v436_v3 = vsel %vm1384_vm4, %v429_v0, 0.0  ;;  %v437_v4 = vsel %vm1301_vm11, %v428_v63, 0.0  ;;  %619 = vmatpush.bf16.msra.mxu2 %v592_v1  ;;  %v596_v5 = vsel %vm565_vm14, %v554_v58, %v559_v53 }
 0x131   : > { %632 = vmatpush.bf16.msra.mxu3 %v596_v5  ;;  %v438_v33 = vpack.c.bf16 %v437_v4, %v436_v3  ;;  %v584_v11 = vsel %vm565_vm14, %v543_v6, %v548_v61  ;;  %v588_v52 = vsel %vm565_vm14, %v544_v9, %v549_v62  ;;  %vm605_vm1 = vcmask 588800  }
 0x132   : > { %v526_v14 = vunpack.c.l.b16 %v448_v2  ;;  %v527_v17 = vunpack.c.h.b16 %v448_v2  ;;  %v656_v29 = vunpack.c.l.b16 %v649_v27  ;;  %v657_v30 = vunpack.c.h.b16 %v649_v27 }
 0x133   : > { %v521_v13 = vunpack.c.l.b16 %v438_v33  ;;  %v522_v16 = vunpack.c.h.b16 %v438_v33 }
 0x134   : > { %620 = vmatpush.bf16.msra.mxu2 %v584_v11  ;;  %v528_v20 = vpack.c.b16 %v526_v14, %v526_v14  ;;  %v529_v23 = vpack.c.b16 %v527_v17, %v527_v17  ;;  %v658_v31 = vpack.c.b16 %v656_v29, %v656_v29  ;;  %v659_v32 = vpack.c.b16 %v657_v30, %v657_v30 }
 0x135   : > { %633 = vmatpush.bf16.msra.mxu3 %v588_v52  ;;  %v523_v19 = vpack.c.b16 %v521_v13, %v521_v13  ;;  %v524_v22 = vpack.c.b16 %v522_v16, %v522_v16 }
 0x136   : > { %v665_v34 = vsel %vm565_vm14, %v658_v31, 0  ;;  %v668_v35 = vsel %vm565_vm14, %v659_v32, 0 }
 0x137   : > { %v568_v24 = vsel %vm565_vm14, %v523_v19, %v528_v20  ;;  %v572_v25 = vsel %vm565_vm14, %v524_v22, %v529_v23  ;;  %677 = vmatpush.bf16.msrb.mxu0 %v665_v34  ;;  %691 = vmatpush.bf16.msrb.mxu1 %v668_v35 }
 0x138   : > { %621 = vmatpush.bf16.msra.mxu2 %v576_v7 }
 0x139   : > { %634 = vmatpush.bf16.msra.mxu3 %v580_v21 }
 0x13a   : > { %916 = vmatmul.msk.bf16.vlgmr.msrb.gmra.mxu0 %vm660_vm5, %v939_v36  ;;  %917 = vmatmul.msk.bf16.vlgmr.msrb.gmra.mxu1 %vm660_vm5, %v939_v36 }
 0x13c   : > { %622 = vmatpush.bf16.msra.mxu2 %v568_v24 }
 0x13d   : > { %635 = vmatpush.bf16.msra.mxu3 %v572_v25 }
 0x13f   : > { %910 = vmatmul.msk.bf16.vlgmr.msra.gmra.mxu2 %vm605_vm1, %v598_v26 }
 0x140   : > { %911 = vmatmul.msk.bf16.vlgmr.msra.gmra.mxu3 %vm605_vm1, %v598_v26 }
 0x199   : > { %v745_v58 = vpop.permute.xlu0 %744 }
 0x19e   : > { %v750_v3 = vpop.permute.xlu1 %749 }
 0x1b7   : > { %v679_v55 = vpop.f32.mrf.mxu0  ;;  %v693_v56 = vpop.f32.mrf.mxu1 }
 0x1bf   : > { %v681_v1 = vpop.f32.mrf.mxu0  ;;  %v695_v4 = vpop.f32.mrf.mxu1 }
 0x1c2   : > { %v624_v40 = vpop.f32.mrf.mxu2 }
 0x1c3   : > { %v625_v41 = vadd.f32 %v624_v40, %v603_v39  ;;  %v637_v42 = vpop.f32.mrf.mxu3 }
 0x1c4   : > { %v638_v43 = vadd.f32 %v637_v42, %v603_v39 }
 0x1c5   : > { %v641_v44 = vmax.f32 %v625_v41, 0.0 }
 0x1c6   : > { %v642_v45 = vmax.f32 %v638_v43, 0.0 }
 0x1c7   : > { %v643_v46 = vpack.c.bf16 %v641_v44, %v641_v44 }
 0x1c8   : > { %v644_v47 = vpack.c.bf16 %v642_v45, %v642_v45 }
 0x1c9   : > { %v707_v49 = vsel %vm565_vm14, %v643_v46, 0 }
 0x1ca   : > { %v626_v51 = vpop.f32.mrf.mxu2  ;;  %719 = vmatpush.bf16.msrb.mxu2 %v707_v49  ;;  %v710_v53 = vsel %vm565_vm14, %v644_v47, 0 }
 0x1cb   : > { %v639_v54 = vpop.f32.mrf.mxu3  ;;  %733 = vmatpush.bf16.msrb.mxu3 %v710_v53 }
 0x1cd   : > { %922 = vmatmul.msk.bf16.vlgmr.msrb.gmra.mxu2 %vm660_vm5, %v938_v50 }
 0x1ce   : > { %923 = vmatmul.msk.bf16.vlgmr.msrb.gmra.mxu3 %vm660_vm5, %v938_v50 }
 0x250   : > { %v721_v57 = vpop.f32.mrf.mxu2 }
 0x251   : > { %v722_v59 = vadd.f32 %v721_v57, %v679_v55  ;;  %v735_v60 = vpop.f32.mrf.mxu3 }
 0x252   : > { %v736_v61 = vadd.f32 %v735_v60, %v693_v56 }
 0x253   : > { %v752_v62 = vadd.f32 %v745_v58, %v722_v59 }
 0x254   : > { %v753_v48 = vadd.f32 %v745_v58, %v736_v61 }
 0x255   : > { %v756_v63 = vmax.f32 %v752_v62, 0.0 }
 0x256   : > { %v757_v0 = vmax.f32 %v753_v48, 0.0 }
 0x257   : > { %760 = vst [vmem:[%s328_s19] sm:$0xff] %v756_v63 }
 0x258   : > { %v723_v2 = vpop.f32.mrf.mxu2  ;;  %761 = vst [vmem:[%s328_s19 + $0x8] sm:$0xff] %v757_v0 }
 0x259   : > { %v724_v5 = vadd.f32 %v723_v2, %v681_v1  ;;  %v737_v6 = vpop.f32.mrf.mxu3 }
 0x25a   : > { %v738_v8 = vadd.f32 %v737_v6, %v695_v4 }
 0x25b   : > { %v754_v33 = vadd.f32 %v750_v3, %v724_v5 }
 0x25c   : > { %v755_v9 = vadd.f32 %v750_v3, %v738_v8 }
 0x25d   : > { %v758_v10 = vmax.f32 %v754_v33, 0.0 }
 0x25e   : > { %v759_v11 = vmax.f32 %v755_v9, 0.0 }
 0x25f   : > { %762 = vst [vmem:[%s328_s19 + $0x10] sm:$0xff] %v758_v10 }
 0x260   : > { %763 = vst [vmem:[%s328_s19 + $0x18] sm:$0xff] %v759_v11 }
 0x261   : > { %1103 = shalt.err (!%p1100_p8)
}
 0x262   : > { %s1156_s13 = smov 256  }
 0x263   : > { %945 = dma.vmem_to_hbm [thread:$0]  (%p1240_p5), %s778_s23, 512, %s780_s9, %s765_s25, %s1156_s13, %s1156_s13, %s1153_s22  }
 0x264 PF: > { %p957_p9 = scmp.ge.s32.totalorder %s1142_s30, 2  ;;  %s794_s19 = sand.u32 1, %s1130_s27  }
 0x265   : > { %s795_s24 = scalar_lea.sflag [#allocation4], %s794_s19 }
 0x266   : > { %p952_p10 = pnand %p957_p9, %p1244_p6 }
 0x268   : > { %p953_p11 = pneg %p952_p10 }
 0x26a   : > { %1125 = dma.done.wait (%p953_p11), %s795_s24, 512  }
 0x26b   : > { %1127 = vsyncadd (%p953_p11), %s795_s24, 4294966784  ;;  %p19_p12 = scmp.ge.s32.totalorder %s1227_s11, 4   ;;  %s1504_s27 = smov %s1134_s28 }
 0x26c   : > { %s1505_s28 = smov %s1138_s29  ;;  %s1506_s29 = smov %s1238_s14 }
 0x26d   : > { %s1507_s30 = smov %s1227_s11  ;;  %21 = sbr.rel (!%p19_p12) target bundleno = 4 (0x4), region = 95 }
 0x272   :  { %801 = vsyncpa [#allocation3], 1 }
 0x273   :  { %803 = vsyncpa [#allocation3 + $0x1], 1 }
 0x274   :  { %804 = vsyncpa [#allocation4], 1 }
 0x275   :  { %806 = vsyncpa [#allocation4 + $0x1], 1 }

</bundles_post_ra>
